<compile_context>
chip_gen: v7x
topology: tpu7x:2x2x1
jax: 0.10.0
libtpu: 0.0.40
codegen_flags: <defaults>
</compile_context>

<pallas_src>
import functools

import jax
import jax.numpy as jnp
from jax import lax
from jax.experimental import pallas as pl
from jax.experimental.pallas import tpu as pltpu


# ---------------------------------------------------------------------------
# Hardware-aware sizing helpers
# ---------------------------------------------------------------------------
def _round_up(x, m):
    return ((x + m - 1) // m) * m


def _cdiv(a, b):
    return (a + b - 1) // b


@functools.lru_cache(maxsize=1)
def _hw_params():
    """Return (vmem_limit_bytes, target_block_bytes), generation-aware."""
    cap = None
    try:
        cap = int(pltpu.get_tpu_info().vmem_capacity_bytes)
    except Exception:
        cap = None
    if cap is None:
        kind = ""
        try:
            kind = jax.devices()[0].device_kind.lower()
        except Exception:
            pass
        cap = 64 * 1024 * 1024 if "v7" in kind else 128 * 1024 * 1024
    # Leave headroom under physical VMEM; never request more than 64 MiB scoped.
    vmem_limit = min(cap * 3 // 4, 64 * 1024 * 1024)
    # Block target sized so double-buffered in+out blocks plus f32 temps fit:
    #   v7x  (64 MiB VMEM)  -> 48 MiB limit, ~6 MiB blocks
    #   v5e / v6e (128 MiB) -> 64 MiB limit, ~8 MiB blocks
    target = min(8 * 1024 * 1024, vmem_limit // 8)
    return vmem_limit, target


def _sublane_granule(dtype):
    # sub-32-bit dtypes pack 2/4 rows per sublane (16 for bf16, 32 for int8)
    return max(8, 32 // jnp.dtype(dtype).itemsize)


def _pick_tile(extent, bytes_per_unit, granule, target, min_programs=2):
    """Tile along one axis: ~`target` bytes per block, multiple of `granule`,
    and (when the extent allows it) at least `min_programs` grid steps so both
    v7x TensorCores get work under dimension_semantics='parallel'."""
    t = max(granule, (target // max(bytes_per_unit, 1)) // granule * granule)
    if min_programs > 1:
        cap = _round_up(_cdiv(extent, min_programs), granule)
        if cap < extent:
            t = min(t, cap)
    return extent if t >= extent else t


# ---------------------------------------------------------------------------
# Kernels (f32 accumulation, EUP rsqrt)
# ---------------------------------------------------------------------------
def _ln_last_kernel(x_ref, w_ref, b_ref, o_ref, *, eps):
    """channels_last general path: (tile_r, C) block, reduce over lane axis."""
    x = x_ref[...].astype(jnp.float32)
    mean = jnp.mean(x, axis=-1, keepdims=True)
    xc = x - mean
    var = jnp.mean(xc * xc, axis=-1, keepdims=True)
    inv = lax.rsqrt(var + eps)
    w = w_ref[...].astype(jnp.float32)                 # (1, C)
    b = b_ref[...].astype(jnp.float32)                 # (1, C)
    o_ref[...] = (xc * inv * w + b).astype(o_ref.dtype)


def _ln_last_packed_kernel(x_ref, w_ref, b_ref, o_ref, *, eps, C):
    """channels_last tiny-C path: k = L//C logical rows packed per 128-lane row.
    Per-segment mean/var via a block-diagonal averaging matmul on the idle MXU,
    so loads/stores stay fully lane-dense (no masked vst)."""
    x = x_ref[...].astype(jnp.float32)                 # (tile, L), L = k*C = 128
    L = x.shape[-1]
    seg_i = lax.broadcasted_iota(jnp.int32, (L, L), 0) // C
    seg_j = lax.broadcasted_iota(jnp.int32, (L, L), 1) // C
    avg = jnp.where(seg_i == seg_j, 1.0 / C, 0.0).astype(jnp.float32)
    mean = jnp.dot(x, avg, preferred_element_type=jnp.float32)       # per-segment mean
    xc = x - mean
    var = jnp.dot(xc * xc, avg, preferred_element_type=jnp.float32)  # per-segment var
    inv = lax.rsqrt(var + eps)
    w = w_ref[...].astype(jnp.float32)                 # (1, L) = k-tiled weight
    b = b_ref[...].astype(jnp.float32)
    o_ref[...] = (xc * inv * w + b).astype(o_ref.dtype)


def _ln_first_batched_kernel(x_ref, w_ref, b_ref, o_ref, *, eps):
    """channels_first, small C*HW: (tile_b, C, HW) block, reduce sublane axis C."""
    x = x_ref[...].astype(jnp.float32)                 # (tile_b, C, HW)
    mean = jnp.mean(x, axis=1, keepdims=True)
    xc = x - mean
    var = jnp.mean(xc * xc, axis=1, keepdims=True)
    inv = lax.rsqrt(var + eps)
    w = w_ref[...].astype(jnp.float32)[None]           # (1, C, 1)
    b = b_ref[...].astype(jnp.float32)[None]
    o_ref[...] = (xc * inv * w + b).astype(o_ref.dtype)


def _ln_first_hw_tiled_kernel(x_ref, w_ref, b_ref, o_ref, *, eps):
    """channels_first, large C*HW: (1, C, tile_hw) block, reduce sublane axis C."""
    x = x_ref[0].astype(jnp.float32)                   # (C, tile_hw)
    mean = jnp.mean(x, axis=0, keepdims=True)
    xc = x - mean
    var = jnp.mean(xc * xc, axis=0, keepdims=True)
    inv = lax.rsqrt(var + eps)
    w = w_ref[...].astype(jnp.float32)                 # (C, 1)
    b = b_ref[...].astype(jnp.float32)
    o_ref[0] = (xc * inv * w + b).astype(o_ref.dtype)


# ---------------------------------------------------------------------------
# Wrappers
# ---------------------------------------------------------------------------
def _layernorm_channels_last(x2d, weight, bias, eps, *, target_block_bytes=None):
    """LayerNorm over the last axis of a (R, C) array."""
    R, C = x2d.shape
    vmem_limit, target = _hw_params()
    if target_block_bytes is not None:
        target = target_block_bytes
    granule = _sublane_granule(x2d.dtype)

    k = 128 // C if (C < 128 and 128 % C == 0) else 1
    if k > 1 and R % k == 0:
        # ---- lane-dense packed path for tiny C (free wrapper reshape) ----
        L = k * C
        Rp = R // k
        xp = x2d.reshape(Rp, L)
        wt = jnp.tile(weight.astype(jnp.float32), (k,)).reshape(1, L)
        bt = jnp.tile(bias.astype(jnp.float32), (k,)).reshape(1, L)
        tile = _pick_tile(Rp, L * 4, granule, target)   # budget by f32 working set
        out = pl.pallas_call(
            functools.partial(_ln_last_packed_kernel, eps=eps, C=C),
            out_shape=jax.ShapeDtypeStruct((Rp, L), x2d.dtype),
            grid_spec=pltpu.PrefetchScalarGridSpec(
                num_scalar_prefetch=0,
                grid=(_cdiv(Rp, tile),),
                in_specs=[
                    pl.BlockSpec((tile, L), lambda i: (i, 0)),
                    pl.BlockSpec((1, L), lambda i: (0, 0)),
                    pl.BlockSpec((1, L), lambda i: (0, 0)),
                ],
                out_specs=pl.BlockSpec((tile, L), lambda i: (i, 0)),
            ),
            compiler_params=pltpu.CompilerParams(
                dimension_semantics=("parallel",),
                vmem_limit_bytes=vmem_limit,
            ),
        )(xp, wt, bt)
        return out.reshape(R, C)

    # ---- general path: C on the lane axis ----
    w2 = weight.reshape(1, C)
    b2 = bias.reshape(1, C)
    tile = _pick_tile(R, C * 4, granule, target)        # budget by f32 working set
    return pl.pallas_call(
        functools.partial(_ln_last_kernel, eps=eps),
        out_shape=jax.ShapeDtypeStruct((R, C), x2d.dtype),
        grid_spec=pltpu.PrefetchScalarGridSpec(
            num_scalar_prefetch=0,
            grid=(_cdiv(R, tile),),
            in_specs=[
                pl.BlockSpec((tile, C), lambda i: (i, 0)),
                pl.BlockSpec((1, C), lambda i: (0, 0)),
                pl.BlockSpec((1, C), lambda i: (0, 0)),
            ],
            out_specs=pl.BlockSpec((tile, C), lambda i: (i, 0)),
        ),
        compiler_params=pltpu.CompilerParams(
            dimension_semantics=("parallel",),
            vmem_limit_bytes=vmem_limit,
        ),
    )(x2d, w2, b2)


def _layernorm_channels_first(x, weight, bias, eps, *, target_block_bytes=None):
    """LayerNorm over axis 1 of a (B, C, H, W) array — no transposes."""
    B, C, H, W = x.shape
    HW = H * W
    x3 = x.reshape(B, C, HW)                           # free (contiguous) reshape
    vmem_limit, target = _hw_params()
    if target_block_bytes is not None:
        target = target_block_bytes
    w2 = weight.reshape(C, 1).astype(jnp.float32)
    b2 = bias.reshape(C, 1).astype(jnp.float32)

    slab_f32_bytes = C * HW * 4
    if slab_f32_bytes <= target:
        # ---- small spatial maps: tile over batch; (C, HW) stays full ----
        tile_b = _pick_tile(B, slab_f32_bytes, 1, target)
        out = pl.pallas_call(
            functools.partial(_ln_first_batched_kernel, eps=eps),
            out_shape=jax.ShapeDtypeStruct((B, C, HW), x.dtype),
            grid_spec=pltpu.PrefetchScalarGridSpec(
                num_scalar_prefetch=0,
                grid=(_cdiv(B, tile_b),),
                in_specs=[
                    pl.BlockSpec((tile_b, C, HW), lambda i: (i, 0, 0)),
                    pl.BlockSpec((C, 1), lambda i: (0, 0)),
                    pl.BlockSpec((C, 1), lambda i: (0, 0)),
                ],
                out_specs=pl.BlockSpec((tile_b, C, HW), lambda i: (i, 0, 0)),
            ),
            compiler_params=pltpu.CompilerParams(
                dimension_semantics=("parallel",),
                vmem_limit_bytes=vmem_limit,
            ),
        )(x3, w2, b2)
    else:
        # ---- large spatial maps: tile H*W on the lane axis ----
        min_prog = 1 if B >= 2 else 2
        tile_hw = _pick_tile(HW, C * 4, 128, target, min_programs=min_prog)
        out = pl.pallas_call(
            functools.partial(_ln_first_hw_tiled_kernel, eps=eps),
            out_shape=jax.ShapeDtypeStruct((B, C, HW), x.dtype),
            grid_spec=pltpu.PrefetchScalarGridSpec(
                num_scalar_prefetch=0,
                grid=(B, _cdiv(HW, tile_hw)),
                in_specs=[
                    pl.BlockSpec((1, C, tile_hw), lambda bi, j: (bi, 0, j)),
                    pl.BlockSpec((C, 1), lambda bi, j: (0, 0)),
                    pl.BlockSpec((C, 1), lambda bi, j: (0, 0)),
                ],
                out_specs=pl.BlockSpec((1, C, tile_hw), lambda bi, j: (bi, 0, j)),
            ),
            compiler_params=pltpu.CompilerParams(
                dimension_semantics=("parallel", "parallel"),
                vmem_limit_bytes=vmem_limit,
            ),
        )(x3, w2, b2)
    return out.reshape(B, C, H, W)


class LayerNorm:
    """Pallas port of the ConvNeXt LayerNorm (channels_last / channels_first)."""

    def __init__(self, normalized_shape, eps=1e-6, data_format="channels_last"):
        if data_format not in ("channels_last", "channels_first"):
            raise NotImplementedError
        if isinstance(normalized_shape, (tuple, list)):
            assert len(normalized_shape) == 1
            normalized_shape = normalized_shape[0]
        self.eps = float(eps)
        self.data_format = data_format
        self.normalized_shape = (normalized_shape,)
        # deterministic init matching nn.Parameter(torch.ones/zeros(...))
        self.weight = jnp.ones((normalized_shape,), dtype=jnp.float32)
        self.bias = jnp.zeros((normalized_shape,), dtype=jnp.float32)

    def __call__(self, x):
        C = self.normalized_shape[0]
        if self.data_format == "channels_last":
            orig_shape = x.shape
            assert orig_shape[-1] == C
            x2d = x.reshape(-1, C)
            y = _layernorm_channels_last(x2d, self.weight, self.bias, self.eps)
            return y.reshape(orig_shape)
        else:
            assert x.ndim == 4 and x.shape[1] == C
            return _layernorm_channels_first(x, self.weight, self.bias, self.eps)


# ---------------------------------------------------------------------------
# References (pure JAX) and smoke test
# ---------------------------------------------------------------------------
def _ref_channels_first(x, weight, bias, eps):
    u = jnp.mean(x, axis=1, keepdims=True)
    s = jnp.mean((x - u) ** 2, axis=1, keepdims=True)
    xn = (x - u) / jnp.sqrt(s + eps)
    return weight[None, :, None, None] * xn + bias[None, :, None, None]


def _ref_channels_last(x, weight, bias, eps):
    u = jnp.mean(x, axis=-1, keepdims=True)
    s = jnp.mean((x - u) ** 2, axis=-1, keepdims=True)
    xn = (x - u) / jnp.sqrt(s + eps)
    return xn * weight + bias


if __name__ == "__main__":
    key = jax.random.PRNGKey(0)
    k1, k2, k3, k4 = jax.random.split(key, 4)

    # channels_first, small C*HW -> batch-tiled path (2 grid programs)
    x_cf = jax.random.normal(k1, (2, 4, 16, 16), dtype=jnp.float32)
    ln_cf = LayerNorm(4, eps=1e-6, data_format="channels_first")
    y_cf = jax.block_until_ready(ln_cf(x_cf))
    ref_cf = _ref_channels_first(x_cf, ln_cf.weight, ln_cf.bias, ln_cf.eps)
    assert y_cf.shape == x_cf.shape
    assert jnp.allclose(y_cf, ref_cf, atol=1e-4, rtol=1e-4)

    # channels_first, force the hw-tiled path with a tiny block target
    x_cf2 = jax.random.normal(k2, (2, 8, 16, 16), dtype=jnp.float32)
    w8 = jnp.ones((8,), jnp.float32)
    b8 = jnp.zeros((8,), jnp.float32)
    y_cf2 = jax.block_until_ready(
        _layernorm_channels_first(x_cf2, w8, b8, 1e-6, target_block_bytes=4096))
    ref_cf2 = _ref_channels_first(x_cf2, w8, b8, 1e-6)
    assert jnp.allclose(y_cf2, ref_cf2, atol=1e-4, rtol=1e-4)

    # channels_last, tiny C=4 -> lane-dense packed path (R=512 divisible by 32)
    x_cl = jax.random.normal(k3, (2, 16, 16, 4), dtype=jnp.float32)
    ln_cl = LayerNorm(4, eps=1e-6, data_format="channels_last")
    y_cl = jax.block_until_ready(ln_cl(x_cl))
    ref_cl = _ref_channels_last(x_cl, ln_cl.weight, ln_cl.bias, ln_cl.eps)
    assert y_cl.shape == x_cl.shape
    assert jnp.allclose(y_cl, ref_cl, atol=1e-4, rtol=1e-4)

    # channels_last, R=105 not divisible by pack factor -> general path, and the
    # two-program split makes a genuinely ragged tail block (rows 56 + 49)
    x_odd = jax.random.normal(k4, (3, 5, 7, 4), dtype=jnp.float32)
    y_odd = jax.block_until_ready(ln_cl(x_odd))
    ref_odd = _ref_channels_last(x_odd, ln_cl.weight, ln_cl.bias, ln_cl.eps)
    assert jnp.allclose(y_odd, ref_odd, atol=1e-4, rtol=1e-4)

    # channels_last, lane-full C=256 with ragged row tail (105 rows -> 56 + 49)
    x_wide = jax.random.normal(k1, (3, 5, 7, 256), dtype=jnp.float32)
    ln_wide = LayerNorm(256, eps=1e-6, data_format="channels_last")
    y_wide = jax.block_until_ready(ln_wide(x_wide))
    ref_wide = _ref_channels_last(x_wide, ln_wide.weight, ln_wide.bias, ln_wide.eps)
    assert jnp.allclose(y_wide, ref_wide, atol=1e-4, rtol=1e-4)

    print("KERNEL_OK")
</pallas_src>

<mosaic_0001>
module attributes {stable_mosaic.version = 11 : i64} {
  func.func @_ln_first_batched_kernel(%arg0: i32, %arg1: memref<1x4x256xf32, #tpu.memory_space<vmem>>, %arg2: memref<4x1xf32, #tpu.memory_space<vmem>>, %arg3: memref<4x1xf32, #tpu.memory_space<vmem>>, %arg4: memref<1x4x256xf32, #tpu.memory_space<vmem>>) attributes {dimension_semantics = [#tpu.dimension_semantics<parallel>], iteration_bounds = array<i64: 2>, scalar_prefetch = 0 : i64, scratch_operands = 0 : i64, tpu.core_type = #tpu.core_type<tc>, window_params = [{transform_indices = @transform_0, window_bounds = array<i64: 1, 4, 256>}, {pipeline_mode = #tpu.pipeline_mode<synchronous>, transform_indices = @transform_1, window_bounds = array<i64: 4, 1>}, {pipeline_mode = #tpu.pipeline_mode<synchronous>, transform_indices = @transform_2, window_bounds = array<i64: 4, 1>}, {transform_indices = @transform_3, window_bounds = array<i64: 1, 4, 256>}]} {
    %c0 = arith.constant 0 : index
    %c0_0 = arith.constant 0 : index
    %c0_1 = arith.constant 0 : index
    %0 = vector.load %arg1[%c0, %c0_0, %c0_1] : memref<1x4x256xf32, #tpu.memory_space<vmem>>, vector<1x4x256xf32>
    %cst = arith.constant dense<0.000000e+00> : vector<1x256xf32>
    %1 = vector.multi_reduction <add>, %0, %cst [1] : vector<1x4x256xf32> to vector<1x256xf32>
    %2 = vector.shape_cast %1 : vector<1x256xf32> to vector<1x1x256xf32>
    %cst_2 = arith.constant 4.000000e+00 : f32
    %3 = vector.broadcast %cst_2 : f32 to vector<1x1x256xf32>
    %4 = arith.divf %2, %3 : vector<1x1x256xf32>
    %5 = vector.broadcast %4 : vector<1x1x256xf32> to vector<1x4x256xf32>
    %6 = arith.subf %0, %5 : vector<1x4x256xf32>
    %7 = arith.mulf %6, %6 : vector<1x4x256xf32>
    %cst_3 = arith.constant dense<0.000000e+00> : vector<1x256xf32>
    %8 = vector.multi_reduction <add>, %7, %cst_3 [1] : vector<1x4x256xf32> to vector<1x256xf32>
    %9 = vector.shape_cast %8 : vector<1x256xf32> to vector<1x1x256xf32>
    %cst_4 = arith.constant 4.000000e+00 : f32
    %10 = vector.broadcast %cst_4 : f32 to vector<1x1x256xf32>
    %11 = arith.divf %9, %10 : vector<1x1x256xf32>
    %cst_5 = arith.constant 9.99999997E-7 : f32
    %12 = vector.broadcast %cst_5 : f32 to vector<1x1x256xf32>
    %13 = arith.addf %11, %12 : vector<1x1x256xf32>
    %14 = math.rsqrt %13 : vector<1x1x256xf32>
    %c0_6 = arith.constant 0 : index
    %c0_7 = arith.constant 0 : index
    %15 = vector.load %arg2[%c0_6, %c0_7] : memref<4x1xf32, #tpu.memory_space<vmem>>, vector<4x1xf32>
    %16 = vector.shape_cast %15 : vector<4x1xf32> to vector<1x4x1xf32>
    %c0_8 = arith.constant 0 : index
    %c0_9 = arith.constant 0 : index
    %17 = vector.load %arg3[%c0_8, %c0_9] : memref<4x1xf32, #tpu.memory_space<vmem>>, vector<4x1xf32>
    %18 = vector.shape_cast %17 : vector<4x1xf32> to vector<1x4x1xf32>
    %19 = vector.broadcast %14 : vector<1x1x256xf32> to vector<1x4x256xf32>
    %20 = arith.mulf %6, %19 : vector<1x4x256xf32>
    %21 = vector.broadcast %16 : vector<1x4x1xf32> to vector<1x4x256xf32>
    %22 = arith.mulf %20, %21 : vector<1x4x256xf32>
    %23 = vector.broadcast %18 : vector<1x4x1xf32> to vector<1x4x256xf32>
    %24 = arith.addf %22, %23 : vector<1x4x256xf32>
    %c0_10 = arith.constant 0 : index
    %c0_11 = arith.constant 0 : index
    %c0_12 = arith.constant 0 : index
    %25 = vector.load %arg4[%c0_10, %c0_11, %c0_12] : memref<1x4x256xf32, #tpu.memory_space<vmem>>, vector<1x4x256xf32>
    tpu.vector_store %arg4[%c0_10, %c0_11, %c0_12], %24 {strides = array<i32>} : memref<1x4x256xf32, #tpu.memory_space<vmem>>, vector<1x4x256xf32>,
    return
  }
  func.func @transform_0(%arg0: i32) -> (i32, i32, i32) {
    %c0_i32 = arith.constant 0 : i32
    %c0_i32_0 = arith.constant 0 : i32
    %c0_i32_1 = arith.constant 0 : i32
    return %arg0, %c0_i32, %c0_i32_0 : i32, i32, i32
  }
  func.func @transform_1(%arg0: i32) -> (i32, i32) {
    %c0_i32 = arith.constant 0 : i32
    %c0_i32_0 = arith.constant 0 : i32
    %c0_i32_1 = arith.constant 0 : i32
    return %c0_i32, %c0_i32_0 : i32, i32
  }
  func.func @transform_2(%arg0: i32) -> (i32, i32) {
    %c0_i32 = arith.constant 0 : i32
    %c0_i32_0 = arith.constant 0 : i32
    %c0_i32_1 = arith.constant 0 : i32
    return %c0_i32, %c0_i32_0 : i32, i32
  }
  func.func @transform_3(%arg0: i32) -> (i32, i32, i32) {
    %c0_i32 = arith.constant 0 : i32
    %c0_i32_0 = arith.constant 0 : i32
    %c0_i32_1 = arith.constant 0 : i32
    return %arg0, %c0_i32, %c0_i32_0 : i32, i32, i32
  }
}

</mosaic_0001>

<bundles_post_ra>
// kernel: tpu_custom_call.1
= control target key start
LH: loop header
LB: loop body
LE: loop exit
PB: predicated region body
PF: predicated region fallthrough
CT: control target
= control target key end

     0   :  { %8 = vsyncpa [#allocation3], 0  ;;  %s913_s0 = inlined_call_operand.hbm [shape: f32[2,4,256], index: 0, kind: input, shape index: {}]   ;;  %s914_s1 = inlined_call_operand.hbm [shape: f32[4,1], index: 1, kind: input, shape index: {}]   ;;  %s915_s2 = inlined_call_operand.hbm [shape: f32[4,1], index: 2, kind: input, shape index: {}]   ;;  %s916_s3 = inlined_call_operand.hbm [shape: f32[2,4,256], index: 3, kind: output, shape index: {}]  }
   0x1   :  { %10 = vsyncpa [#allocation3 + $0x1], 0 }
   0x2   :  { %11 = vsyncpa [#allocation6], 0 }
   0x3   :  { %12 = vsyncpa [#allocation4], 0 }
   0x4   :  { %14 = vsyncpa [#allocation4 + $0x1], 0  ;;  %s680_s12 = smov 0   ;;  %s682_s13 = smov 0  }
   0x5   :  { %s684_s14 = smov 0   ;;  %s686_s15 = smov 0  }
   0x6 LB: > { %s701_s16 = sadd.s32 4294967295, %s652_s15   ;;  %s401_s17 = sadd.s32 4294967294, %s652_s15   ;;  %s652_s15 = sphi %s686_s15, %s936_s15   ;;  %s648_s14 = sphi %s684_s14, %s935_s14   ;;  %s644_s13 = sphi %s682_s13, %s934_s13   ;;  %s640_s12 = sphi %s680_s12, %s933_s12  }
   0x7   : > { %p40_p0 = scmp.ne.s32.totalorder %s644_s13, %s640_s12  ;;  %p917_p1 = scmp.eq.s32.totalorder %s701_s16, 0 }
   0x8   : > { %p112_p3 = scmp.eq.s32.totalorder %s401_s17, 1  ;;  %p402_p5 = scmp.ge.s32.totalorder %s652_s15, 1 }
   0x9   : > { %p710_p4 = por %p917_p1, %p40_p0  ;;  %p119_p7 = scmp.lt.s32.totalorder %s652_s15, 3 }
   0xa   : > { %p715_p6 = por %p112_p3, %p40_p0  ;;  %s654_s21 = smov [#allocation5]  }
   0xb   : > { %s920_s18 = scalar_select %p710_p4, 1, 0 }
   0xc   : > { %s921_s19 = scalar_select %p715_p6, 1, 0 }
   0xd   : > { %p720_p8 = pnand %p402_p5, %p119_p7  ;;  %s132_s22 = sshll.u32 %s654_s21, 4  ;;  %s133_s22 = int_to_ptr.vmem [resolvable:$true] %s132_s22 }
   0xe   : > { %s655_s23 = smov [#allocation7]   ;;  %s736_s26 = sadd.s32 1, %s652_s15  }
   0xf   : > { %s922_s20 = scalar_select %p720_p8, 1, 0 }
  0x10   : > { %p433_p10 = pneg %p720_p8  ;;  %s143_s24 = sshll.u32 %s655_s23, 4  ;;  %s733_s24 = int_to_ptr.vmem [resolvable:$true] %s143_s24 }
  0x11   : > { %s24_s27 = ssub.s32 %s652_s15, %s736_s26  ;;  %s496_s30 = scalar_lea.hbm %s914_s1, 64 }
  0x12   : > { %p729_p11 = pnand %p433_p10, %p917_p1  ;;  %p497_p12 = scmp.ne.s32.totalorder %s914_s1, %s496_s30 }
  0x13   : > { %p503_p5 = scmp.lt.u32.totalorder %s496_s30, %s914_s1 }
  0x14   : > { %p498_p13 = pneg %p729_p11 }
  0x16   : > { %p499_p0 = pnand %p498_p13, %p497_p12 }
  0x18   : > { %p500_p3 = pneg %p499_p0 }
  0x1a   : > { %p505_p7 = pnand %p503_p5, %p500_p3 }
  0x1c   : > { %508 = shalt.err (!%p505_p7)
}
  0x1d   : > { %s509_s8 = scalar_lea.vmem %s133_s22, 64  ;;  %p517_p2 = scmp.lt.s32.totalorder %s133_s22, %s133_s22 }
  0x1e   : > { %p510_p10 = scmp.ne.s32.totalorder %s133_s22, %s509_s8  ;;  %p518_p6 = scmp.lt.s32.totalorder %s509_s8, %s509_s8 }
  0x20   : > { %p512_p9 = pnand %p510_p10, %p498_p13  ;;  %p519_p4 = por %p518_p6, %p517_p2 }
  0x22   : > { %p513_p1 = pneg %p512_p9 }
  0x24   : > { %p520_p8 = pnand %p519_p4, %p513_p1 }
  0x26   : > { %523 = shalt.err (!%p520_p8)
}
  0x27   : > { %436 = dma.hbm_to_vmem [thread:$0]  (!%p729_p11), %s914_s1, 64, %s133_s22, [#allocation6]  }
  0x28   : > { %s524_s21 = scalar_lea.hbm %s915_s2, 64 }
  0x29   : > { %p525_p9 = scmp.ne.s32.totalorder %s915_s2, %s524_s21  ;;  %p531_p4 = scmp.lt.u32.totalorder %s524_s21, %s915_s2 }
  0x2b   : > { %p527_p2 = pnand %p525_p9, %p498_p13 }
  0x2d   : > { %p528_p1 = pneg %p527_p2 }
  0x2f   : > { %p533_p6 = pnand %p531_p4, %p528_p1 }
  0x31   : > { %536 = shalt.err (!%p533_p6)
}
  0x32   : > { %s537_s22 = scalar_lea.vmem %s733_s24, 64  ;;  %p545_p3 = scmp.lt.s32.totalorder %s733_s24, %s733_s24 }
  0x33   : > { %p538_p8 = scmp.ne.s32.totalorder %s733_s24, %s537_s22  ;;  %p546_p5 = scmp.lt.s32.totalorder %s537_s22, %s537_s22 }
  0x35   : > { %p540_p12 = pnand %p538_p8, %p498_p13  ;;  %p547_p7 = por %p546_p5, %p545_p3 }
  0x37   : > { %p541_p0 = pneg %p540_p12 }
  0x39   : > { %p548_p10 = pnand %p547_p7, %p541_p0 }
  0x3b   : > { %551 = shalt.err (!%p548_p10)
}
  0x3c   : > { %439 = dma.hbm_to_vmem [thread:$0]  (!%p729_p11), %s915_s2, 64, %s733_s24, [#allocation6]  }
  0x3d   : > { %p25_p13 = scmp.eq.s32.totalorder %s24_s27, 0  ;;  %s27_s6 = sadd.s32 1, %s648_s14 }
  0x3e   : > { %p34_p9 = scmp.ne.s32.totalorder %s648_s14, %s644_s13  ;;  %p35_p2 = scmp.eq.s32.totalorder %s652_s15, 0 }
  0x3f   : > { %s795_s25 = scalar_select %p25_p13, %s648_s14, %s27_s6  }
  0x40   : > { %p36_p1 = por %p35_p2, %p34_p9  ;;  %p924_p4 = scmp.eq.s32.totalorder %s701_s16, 1 }
  0x41   : > { %p450_p8 = scmp.lt.s32.totalorder %s652_s15, 2  ;;  %s154_s8 = sand.u32 1, %s648_s14  }
  0x42   : > { %p799_p6 = por %p924_p4, %p34_p9  ;;  %s406_s9 = sshll.u32 %s154_s8, 3 }
  0x43   : > { %s419_s10 = sshll.u32 %s652_s15, 7  ;;  %s158_s27 = scalar_lea.vmem [#allocation2], %s406_s9 }
  0x44   : > { %s809_s24 = scalar_lea.hbm %s913_s0, %s419_s10  ;;  %s166_s21 = sshll.u32 %s158_s27, 4  ;;  %s811_s21 = int_to_ptr.vmem [resolvable:$true] %s166_s21 }
  0x45   : > { %p813_p11 = pnand %p450_p8, %p36_p1  ;;  %s155_s28 = scalar_lea.sflag [#allocation3], %s154_s8 }
  0x46   : > { %s552_s29 = scalar_lea.hbm %s809_s24, 128  ;;  %s557_s4 = scalar_lea.hbm %s913_s0, 256 }
  0x47   : > { %p553_p12 = scmp.ne.s32.totalorder %s809_s24, %s552_s29  ;;  %p554_p0 = pneg %p813_p11 }
  0x48   : > { %p558_p7 = scmp.lt.u32.totalorder %s809_s24, %s913_s0  ;;  %p559_p10 = scmp.lt.u32.totalorder %s557_s4, %s552_s29 }
  0x49   : > { %p555_p3 = pnand %p554_p0, %p553_p12  ;;  %p561_p9 = scmp.lt.u32.totalorder %s552_s29, %s809_s24 }
  0x4a   : > { %p560_p13 = por %p559_p10, %p558_p7 }
  0x4b   : > { %p556_p5 = pneg %p555_p3 }
  0x4c   : > { %p562_p2 = por %p561_p9, %p560_p13 }
  0x4e   : > { %p563_p1 = pnand %p562_p2, %p556_p5 }
  0x50   : > { %566 = shalt.err (!%p563_p1)
}
  0x51   : > { %s567_s8 = scalar_lea.vmem %s811_s21, 128  ;;  %s656_s9 = smov [#allocation2]  }
  0x52   : > { %p568_p4 = scmp.ne.s32.totalorder %s811_s21, %s567_s8  ;;  %s572_s10 = sshll.u32 %s656_s9, 4  ;;  %s573_s10 = int_to_ptr.vmem [resolvable:$false] %s572_s10 }
  0x53   : > { %s574_s11 = scalar_lea.vmem %s573_s10, 256  ;;  %p575_p3 = scmp.lt.s32.totalorder %s811_s21, %s573_s10 }
  0x54   : > { %p570_p8 = pnand %p568_p4, %p554_p0  ;;  %p576_p7 = scmp.lt.s32.totalorder %s574_s11, %s567_s8 }
  0x56   : > { %p571_p12 = pneg %p570_p8  ;;  %p577_p10 = por %p576_p7, %p575_p3 }
  0x58   : > { %p578_p13 = pnand %p577_p10, %p571_p12 }
  0x5a   : > { %581 = shalt.err (!%p578_p13)
}
  0x5b   : > { %443 = dma.hbm_to_vmem [thread:$0]  (!%p813_p11), %s809_s24, 128, %s811_s21, %s155_s28  }
  0x5c   : > { %p927_p5 = scmp.ne.s32.totalorder %s922_s20, 0 }
  0x5d   : > { %s845_s17 = sand.u32 (!%p927_p5), 1, %s644_s13   ;;  %p928_p0 = scmp.ne.s32.totalorder (!%p927_p5), %s920_s18, 0 }
  0x5e   : > { %175 = sbr.rel (%p927_p5) target bundleno = 257 (0x101), region = 32  ;;  %s410_s27 = sshll.u32 (!%p927_p5), %s845_s17, 3 }
  0x5f   : > { %s178_s29 = scalar_lea.sflag (!%p927_p5), [#allocation3], %s845_s17  ;;  %s181_s30 = scalar_lea.vmem (!%p927_p5), [#allocation2], %s410_s27 }
  0x65   : > { %627 = dma.done.wait (%p928_p0), %s178_s29, 128  }
  0x66   : > { %629 = vsyncadd (%p928_p0), %s178_s29, 4294967168  ;;  %p929_p11 = scmp.eq.s32.totalorder %s701_s16, 0 }
  0x68   : > { %631 = dma.done.wait (%p929_p11), [#allocation6], 128   ;;  %p930_p9 = pmov %p929_p11 }
  0x69   : > { %v657_v0 = vmov 0   ;;  %v263_v1 = vld [vmem:[#allocation5] sm:$0xf]  ;;  %v264_v2 = vld [vmem:[#allocation7] sm:$0xf]  ;;  %v212_v3 = vld [vmem:[%s181_s30] sm:$0xff]  ;;  %v277_v45 = vlaneseq }
  0x6a   : > { %633 = vsyncadd (%p930_p9), [#allocation6], 4294967168  ;;  %490 = vset.pattern.permute.xlu0 %v657_v0  ;;  %v214_v4 = vcombine.high %v212_v3, %v212_v3  ;;  %vm216_vm0 = vcmask 1043456   ;;  %v658_v43 = vmov 839922192   ;;  %s420_s18 = sshll.u32 %s701_s16, 7 }
  0x6b   : > { %272 = vperm.xlu0 %490, %v263_v1   ;;  %v217_v5 = vsel %vm216_vm0, %v212_v3, 0.0  ;;  %v275_v44 = vunpack.c.l.s4 %v658_v43  ;;  %v278_v48 = vshrl.u32 %v277_v45, 7  ;;  %s211_s20 = scalar_lea.vmem [#allocation8], %s410_s27  ;;  %s869_s28 = scalar_lea.hbm %s916_s3, %s420_s18 }
  0x6c   : > { %v224_v6 = vsel %vm216_vm0, %v214_v4, 0.0  ;;  %v218_v7 = vrot.slane %v217_v5, 4  ;;  %s312_s24 = sshll.u32 %s211_s20, 4  ;;  %s298_s22 = scalar_lea.sflag [#allocation4], %s845_s17  ;;  %s871_s24 = int_to_ptr.vmem [resolvable:$true] %s312_s24 }
  0x6d   : > { %v225_v8 = vrot.slane %v224_v6, 4  ;;  %v276_v47 = vunpack.c.0.s8 %v275_v44  ;;  %s582_s4 = scalar_lea.vmem %s871_s24, 128  ;;  %s659_s16 = smov [#allocation8]  }
  0x6e   : > { %v219_v9 = vadd.f32 %v218_v7, %v217_v5  ;;  %p583_p2 = scmp.ne.s32.totalorder %s871_s24, %s582_s4  ;;  %s586_s5 = sshll.u32 %s659_s16, 4  ;;  %s587_s5 = int_to_ptr.vmem [resolvable:$false] %s586_s5 }
  0x6f   : > { %285 = vperm.xlu0 %490, %v264_v2   ;;  %v226_v10 = vadd.f32 %v225_v8, %v224_v6  ;;  %v279_v50 = vsub.s32 %v276_v47, %v278_v48  ;;  %s588_s6 = scalar_lea.vmem %s587_s5, 256  ;;  %p589_p8 = scmp.lt.s32.totalorder %s871_s24, %s587_s5 }
  0x70   : > { %v220_v11 = vrot.slane %v219_v9, 2  ;;  %p584_p1 = pnand %p583_p2, %p799_p6  ;;  %p590_p12 = scmp.lt.s32.totalorder %s588_s6, %s582_s4 }
  0x71   : > { %v227_v12 = vrot.slane %v226_v10, 2 }
  0x72   : > { %v221_v13 = vadd.f32 %v220_v11, %v219_v9  ;;  %p585_p4 = pneg %p584_p1  ;;  %p591_p3 = por %p590_p12, %p589_p8 }
  0x73   : > { %v228_v14 = vadd.f32 %v227_v12, %v226_v10 }
  0x74   : > { %v222_v15 = vrot.slane %v221_v13, 1  ;;  %p592_p7 = pnand %p591_p3, %p585_p4 }
  0x75   : > { %v229_v16 = vrot.slane %v228_v14, 1 }
  0x76   : > { %v223_v17 = vadd.f32 %v222_v15, %v221_v13 }
  0x77   : > { %v230_v18 = vadd.f32 %v229_v16, %v228_v14 }
  0x78   : > { %v232_v19 = vmul.f32 0.25, %v223_v17 }
  0x79   : > { %v233_v20 = vmul.f32 0.25, %v230_v18 }
  0x7b   : > { %v236_v21 = vcombine.low %v232_v19, %v233_v20 }
  0x7d   : > { %v238_v22 = vsub.f32 %v212_v3, %v236_v21 }
  0x7f   : > { %v239_v23 = vmul.f32 %v238_v22, %v238_v22 }
  0x81   : > { %v241_v24 = vcombine.high %v239_v23, %v239_v23  ;;  %v243_v25 = vsel %vm216_vm0, %v239_v23, 0.0 }
  0x82   : > { %v244_v27 = vrot.slane %v243_v25, 4 }
  0x83   : > { %v250_v26 = vsel %vm216_vm0, %v241_v24, 0.0 }
  0x84   : > { %v251_v28 = vrot.slane %v250_v26, 4  ;;  %v245_v29 = vadd.f32 %v244_v27, %v243_v25 }
  0x86   : > { %v252_v30 = vadd.f32 %v251_v28, %v250_v26  ;;  %v246_v31 = vrot.slane %v245_v29, 2 }
  0x88   : > { %v253_v32 = vrot.slane %v252_v30, 2  ;;  %v247_v33 = vadd.f32 %v246_v31, %v245_v29 }
  0x8a   : > { %v254_v34 = vadd.f32 %v253_v32, %v252_v30  ;;  %v248_v35 = vrot.slane %v247_v33, 1 }
  0x8c   : > { %v255_v36 = vrot.slane %v254_v34, 1  ;;  %v249_v37 = vadd.f32 %v248_v35, %v247_v33 }
  0x8e   : > { %v256_v38 = vadd.f32 %v255_v36, %v254_v34  ;;  %v257_v39 = vmul.f32 0.25, %v249_v37 }
  0x90   : > { %v258_v40 = vmul.f32 0.25, %v256_v38  ;;  %v259_v41 = vadd.f32 1e-06, %v257_v39 }
  0x92   : > { %v260_v42 = vadd.f32 1e-06, %v258_v40  ;;  %492 = vrsqrt.f32 %v259_v41 }
  0x94   : > { %494 = vrsqrt.f32 %v260_v42 }
  0x9c   : > { %v493_v46 = vpop.eup %492 }
  0x9e   : > { %v495_v49 = vpop.eup %494 }
  0x9f   : > { %v267_v51 = vcombine.low %v493_v46, %v495_v49 }
  0xa1   : > { %v269_v53 = vmul.f32 %v267_v51, %v238_v22 }
  0xea   : > { %v273_v52 = vpop.permute.xlu0 %272 }
  0xeb   : > { %v280_v54 = vrot.slane %v273_v52, %v279_v50 }
  0xed   : > { %v282_v56 = vmul.f32 %v280_v54, %v269_v53 }
  0xee   : > { %v286_v55 = vpop.permute.xlu0 %285 }
  0xef   : > { %v293_v57 = vrot.slane %v286_v55, %v279_v50 }
  0xf1   : > { %v295_v58 = vadd.f32 %v293_v57, %v282_v56 }
  0xf3   : > { %296 = vst [vmem:[%s211_s20] sm:$0xff] %v295_v58 }
  0xf4   : > { %595 = shalt.err (!%p592_p7)
}
  0xf5   : > { %s596_s8 = scalar_lea.hbm %s869_s28, 128  ;;  %s600_s11 = scalar_lea.hbm %s916_s3, 256 }
  0xf6   : > { %p597_p10 = scmp.ne.s32.totalorder %s869_s28, %s596_s8  ;;  %p601_p0 = scmp.lt.u32.totalorder %s869_s28, %s916_s3 }
  0xf7   : > { %p602_p11 = scmp.lt.u32.totalorder %s600_s11, %s596_s8  ;;  %p604_p2 = scmp.lt.u32.totalorder %s596_s8, %s869_s28 }
  0xf8   : > { %p598_p13 = pnand %p597_p10, %p799_p6 }
  0xf9   : > { %p603_p9 = por %p602_p11, %p601_p0 }
  0xfa   : > { %p599_p5 = pneg %p598_p13 }
  0xfb   : > { %p605_p1 = por %p604_p2, %p603_p9 }
  0xfd   : > { %p606_p4 = pnand %p605_p1, %p599_p5 }
  0xff   : > { %609 = shalt.err (!%p606_p4)
}
 0x100   : > { %431 = dma.vmem_to_hbm [thread:$0]  (%p799_p6), %s871_s24, 128, %s869_s28, %s298_s22  }
 0x101 PF: > { %s324_s29 = sand.u32 1, %s640_s12   ;;  %p931_p8 = scmp.ne.s32.totalorder %s921_s19, 0 }
 0x102   : > { %p932_p12 = scmp.ge.s32.totalorder %s652_s15, 2  ;;  %s325_s30 = scalar_lea.sflag [#allocation4], %s324_s29 }
 0x104   : > { %p445_p3 = pnand %p932_p12, %p931_p8 }
 0x106   : > { %635 = dma.done.wait (!%p445_p3), %s325_s30, 128  }
 0x107   : > { %637 = vsyncadd (!%p445_p3), %s325_s30, 4294967168  ;;  %p17_p7 = scmp.ge.s32.totalorder %s736_s26, 4   ;;  %s933_s12 = smov %s644_s13 }
 0x108   : > { %s934_s13 = smov %s648_s14  ;;  %s935_s14 = smov %s795_s25 }
 0x109   : > { %s936_s15 = smov %s736_s26  ;;  %19 = sbr.rel (!%p17_p7) target bundleno = 6 (0x6), region = 85 }
 0x110   :  { %330 = vsyncpa [#allocation3], 1 }
 0x111   :  { %332 = vsyncpa [#allocation3 + $0x1], 1 }
 0x112   :  { %333 = vsyncpa [#allocation6], 1 }
 0x113   :  { %334 = vsyncpa [#allocation4], 1 }
 0x114   :  { %336 = vsyncpa [#allocation4 + $0x1], 1 }

</bundles_post_ra>
